<compile_context>
chip_gen: v5e
topology: v5e:2x2
jax: 0.10.0
libtpu: 0.0.40
codegen_flags: <defaults>
</compile_context>

<pallas_src>
import jax
import jax.numpy as jnp
from jax.experimental import pallas as pl
from jax.experimental.pallas import tpu as pltpu

LEAKY_SLOPE = 0.2
BN_EPS = 1e-5


def _round_up(x, m):
    return ((x + m - 1) // m) * m


def _choose_tile_b(B, tile_b):
    """Pick a batch tile: big tiles for low per-step overhead, but >=2 grid steps
    along the parallel batch axis when the batch allows (v7x megacore)."""
    if B <= 16:
        return _round_up(B, 8)
    if B <= tile_b:
        return _round_up((B + 1) // 2, 8)
    return tile_b


def _setop_kernel(a_ref, b_ref,
                  w_a_ref, w_b_ref, sh_ab_ref,
                  w_res_ref, sh_res_ref,
                  w_out_ref, b_out_ref,
                  o_ref,
                  out_sc, res_sc):
    """Grid = (batch_tiles, layers). Layer axis is innermost ('arbitrary');
    out_sc / res_sc carry the running activation and residual across it."""
    l = pl.program_id(1)

    @pl.when(l == 0)
    def _init():
        a = a_ref[...]                                     # (TB, Dp) bf16
        b = b_ref[...]
        # net_ab: cat(a,b) @ W_ab == a @ W_a + b @ W_b ; BN + bias folded into sh_ab.
        h = (jnp.dot(a, w_a_ref[...], preferred_element_type=jnp.float32)
             + jnp.dot(b, w_b_ref[...], preferred_element_type=jnp.float32)
             + sh_ab_ref[...])
        h = jnp.maximum(h, LEAKY_SLOPE * h)                # LeakyReLU(0.2)
        out_sc[...] = h.astype(out_sc.dtype)               # keep bf16 between layers
        # residual: arithm_op(a, b) = a + b
        res_sc[...] = a.astype(jnp.float32) + b.astype(jnp.float32)

    # residual layer l: Linear + folded BN + residual + LeakyReLU(0.2)
    h = (jnp.dot(out_sc[...], w_res_ref[0], preferred_element_type=jnp.float32)
         + sh_res_ref[0]
         + res_sc[...])
    h = jnp.maximum(h, LEAKY_SLOPE * h)
    out_sc[...] = h.astype(out_sc.dtype)

    @pl.when(l == pl.num_programs(1) - 1)
    def _final():
        y = (jnp.dot(out_sc[...], w_out_ref[...], preferred_element_type=jnp.float32)
             + b_out_ref[...])
        # dropout(p=0.5) with training=False is identity -> nothing to do.
        o_ref[...] = jnp.maximum(y, 0.0).astype(o_ref.dtype)


def setop_res_block_v1(a, b, kparams, *, tile_b=512):
    """a, b: (B, D) float32. kparams: folded + lane-padded params (see fold_params)."""
    B, D = a.shape
    L = int(kparams["w_res"].shape[0])
    Dp = int(kparams["w_a"].shape[1])          # feature dim padded to a 128 multiple
    assert L >= 1, "layers_num must be >= 1"

    tb = _choose_tile_b(B, tile_b)
    B_pad = _round_up(B, tb)

    def prep(x):
        if B_pad != B or Dp != D:
            x = jnp.pad(x, ((0, B_pad - B), (0, Dp - D)))
        return x.astype(jnp.bfloat16)          # halve streamed activation bytes

    a_p = prep(a)
    b_p = prep(b)
    grid = (B_pad // tb, L)

    # Advisory cost: (L + 3) DxD matmuls per padded batch row.
    flops = 2 * B_pad * Dp * Dp * (L + 3)
    w_bytes = sum(int(v.size) * v.dtype.itemsize for v in kparams.values())
    bytes_accessed = 2 * B_pad * Dp * 2 + B_pad * Dp * 4 + w_bytes * (B_pad // tb)

    # Explicit scoped-VMEM budget: invariant weights + one streamed w_res layer
    # block + double-buffered activation tiles + scratch + headroom.
    vmem_need = (
        3 * Dp * Dp * 2 * 2          # w_a, w_b, w_out (bf16, worst-case 2 buffers)
        + Dp * Dp * 2 * 2            # per-layer w_res block, double-buffered
        + 2 * tb * Dp * 2 * 2        # a, b tiles (bf16), double-buffered
        + tb * Dp * 4 * 2            # output tile (f32), double-buffered
        + tb * Dp * (2 + 4)          # scratch: out_sc bf16 + res_sc f32
        + (L + 3) * Dp * 4 * 2       # shift / bias rows
        + (2 << 20)                  # headroom
    )
    vmem_limit = int(min(max(vmem_need, 32 << 20), 96 << 20))

    out = pl.pallas_call(
        _setop_kernel,
        out_shape=jax.ShapeDtypeStruct((B_pad, Dp), jnp.float32),
        grid_spec=pltpu.PrefetchScalarGridSpec(
            num_scalar_prefetch=0,
            grid=grid,
            in_specs=[
                pl.BlockSpec((tb, Dp), lambda i, l: (i, 0)),        # a   (bf16)
                pl.BlockSpec((tb, Dp), lambda i, l: (i, 0)),        # b   (bf16)
                pl.BlockSpec((Dp, Dp), lambda i, l: (0, 0)),        # w_a (bf16)
                pl.BlockSpec((Dp, Dp), lambda i, l: (0, 0)),        # w_b (bf16)
                pl.BlockSpec((1, Dp), lambda i, l: (0, 0)),         # sh_ab (f32)
                pl.BlockSpec((1, Dp, Dp), lambda i, l: (l, 0, 0)),  # w_res layer l
                pl.BlockSpec((1, 1, Dp), lambda i, l: (l, 0, 0)),   # sh_res layer l
                pl.BlockSpec((Dp, Dp), lambda i, l: (0, 0)),        # w_out (bf16)
                pl.BlockSpec((1, Dp), lambda i, l: (0, 0)),         # b_out (f32)
            ],
            out_specs=pl.BlockSpec((tb, Dp), lambda i, l: (i, 0)),
            scratch_shapes=[
                pltpu.VMEM((tb, Dp), jnp.bfloat16),   # running activation
                pltpu.VMEM((tb, Dp), jnp.float32),    # residual a + b
            ],
        ),
        compiler_params=pltpu.CompilerParams(
            dimension_semantics=("parallel", "arbitrary"),
            vmem_limit_bytes=vmem_limit),
        cost_estimate=pl.CostEstimate(
            flops=flops, transcendentals=0, bytes_accessed=bytes_accessed),
    )(a_p, b_p,
      kparams["w_a"], kparams["w_b"], kparams["sh_ab"],
      kparams["w_res"], kparams["sh_res"],
      kparams["w_out"], kparams["b_out"])
    return out[:B, :D]


def init_raw_params(key, input_dim, layers_num):
    """Deterministic synthetic parameters matching the PyTorch module shapes.

    Linear weights are stored already transposed to (in, out) so x @ W + b matches
    torch's x @ W_t.T + b. BN params are the raw gamma/beta/running_mean/running_var.
    """
    D = input_dim

    def bn_params(k, shape):
        kg, kb, km, kv = jax.random.split(k, 4)
        gamma = 1.0 + 0.1 * jax.random.normal(kg, shape, jnp.float32)
        beta = 0.1 * jax.random.normal(kb, shape, jnp.float32)
        mean = 0.1 * jax.random.normal(km, shape, jnp.float32)
        var = jnp.abs(1.0 + 0.1 * jax.random.normal(kv, shape, jnp.float32))
        return gamma, beta, mean, var

    ks = jax.random.split(key, 8)
    return {
        "w_ab": 0.05 * jax.random.normal(ks[0], (2 * D, D), jnp.float32),
        "b_ab": 0.05 * jax.random.normal(ks[1], (D,), jnp.float32),
        "bn_ab": bn_params(ks[2], (D,)),
        "w_res": 0.05 * jax.random.normal(ks[3], (layers_num, D, D), jnp.float32),
        "b_res": 0.05 * jax.random.normal(ks[4], (layers_num, D), jnp.float32),
        "bn_res": bn_params(ks[5], (layers_num, D)),
        "w_out": 0.05 * jax.random.normal(ks[6], (D, D), jnp.float32),
        "b_out": 0.05 * jax.random.normal(ks[7], (D,), jnp.float32),
    }


def fold_params(raw, eps=BN_EPS):
    """Fold eval-mode BN + linear bias into weight columns and a single shift vector,
    split W_ab into W_a / W_b, and zero-pad the feature dim up to a 128 multiple so
    every matmul and the output store are lane-dense. Zero padding keeps the padded
    lanes exactly 0 through LeakyReLU / ReLU, so they can be sliced off afterwards.

    scale = gamma / sqrt(var + eps); shift = beta - mean * scale
    W'    = W * scale (per output column);  shift' = bias * scale + shift
    Weights are cast to bf16 for the MXU (f32 accumulation in-kernel); shifts stay f32.
    """
    D = raw["w_out"].shape[0]
    L = raw["w_res"].shape[0]
    Dp = _round_up(D, 128)

    def pad2(w):                      # (d_in, D) -> (Dp, Dp), zero-filled
        return jnp.pad(w, ((0, Dp - w.shape[0]), (0, Dp - w.shape[1])))

    def padv(v):                      # (..., D) -> (..., Dp), zero-filled
        pads = [(0, 0)] * (v.ndim - 1) + [(0, Dp - v.shape[-1])]
        return jnp.pad(v, pads)

    g, be, m, v = raw["bn_ab"]
    sc = g / jnp.sqrt(v + eps)
    sh = be - m * sc
    w_ab = raw["w_ab"] * sc[None, :]                       # (2D, D), BN folded
    w_a = pad2(w_ab[:D]).astype(jnp.bfloat16)
    w_b = pad2(w_ab[D:]).astype(jnp.bfloat16)
    sh_ab = padv((raw["b_ab"] * sc + sh)[None, :])         # (1, Dp) f32

    g, be, m, v = raw["bn_res"]                            # each (L, D)
    sc = g / jnp.sqrt(v + eps)
    sh = be - m * sc
    w_res = raw["w_res"] * sc[:, None, :]                  # (L, D, D)
    w_res = jnp.pad(w_res, ((0, 0), (0, Dp - D), (0, Dp - D))).astype(jnp.bfloat16)
    sh_res = padv((raw["b_res"] * sc + sh)[:, None, :])    # (L, 1, Dp) f32

    return {
        "w_a": w_a, "w_b": w_b, "sh_ab": sh_ab,
        "w_res": w_res, "sh_res": sh_res,
        "w_out": pad2(raw["w_out"]).astype(jnp.bfloat16),
        "b_out": padv(raw["b_out"][None, :]),
    }


def _reference(a, b, raw, eps=BN_EPS):
    """Pure-JAX f32 reference with unfolded params (ground truth for semantics)."""
    def bn(x, params, i=None):
        g, be, m, v = params
        if i is not None:
            g, be, m, v = g[i], be[i], m[i], v[i]
        return (x - m) / jnp.sqrt(v + eps) * g + be

    out = jnp.concatenate([a, b], axis=1) @ raw["w_ab"] + raw["b_ab"]
    out = bn(out, raw["bn_ab"])
    out = jnp.where(out > 0, out, LEAKY_SLOPE * out)
    res = a + b
    for i in range(raw["w_res"].shape[0]):
        h = out @ raw["w_res"][i] + raw["b_res"][i]
        h = bn(h, raw["bn_res"], i) + res
        out = jnp.where(h > 0, h, LEAKY_SLOPE * h)
    y = out @ raw["w_out"] + raw["b_out"]
    return jnp.maximum(y, 0.0)


if __name__ == "__main__":
    # TODO(synk): training-mode BatchNorm (batch-stat updates) and dropout noise are
    # not implemented; the kernel is the eval-mode forward, matching module.eval().
    B, D, LAYERS = 8, 32, 2
    key = jax.random.PRNGKey(0)
    ka, kb, kp = jax.random.split(key, 3)
    a = jax.random.normal(ka, (B, D), jnp.float32)
    b = jax.random.normal(kb, (B, D), jnp.float32)

    raw = init_raw_params(kp, D, LAYERS)
    kparams = fold_params(raw)

    out = setop_res_block_v1(a, b, kparams)
    out = jax.block_until_ready(out)

    ref = _reference(a, b, raw)
    assert out.shape == (B, D)
    # bf16 MXU operands + bf16-pre-cast activations vs a pure-f32 reference.
    assert jnp.allclose(out, ref, atol=5e-2, rtol=5e-2), "mismatch vs reference"
    print("KERNEL_OK")
</pallas_src>

<mosaic_0001>
module attributes {stable_mosaic.version = 11 : i64} {
  func.func @_setop_kernel(%arg0: i32, %arg1: i32, %arg2: memref<8x128xbf16, #tpu.memory_space<vmem>>, %arg3: memref<8x128xbf16, #tpu.memory_space<vmem>>, %arg4: memref<128x128xbf16, #tpu.memory_space<vmem>>, %arg5: memref<128x128xbf16, #tpu.memory_space<vmem>>, %arg6: memref<1x128xf32, #tpu.memory_space<vmem>>, %arg7: memref<1x128x128xbf16, #tpu.memory_space<vmem>>, %arg8: memref<1x1x128xf32, #tpu.memory_space<vmem>>, %arg9: memref<128x128xbf16, #tpu.memory_space<vmem>>, %arg10: memref<1x128xf32, #tpu.memory_space<vmem>>, %arg11: memref<8x128xf32, #tpu.memory_space<vmem>>, %arg12: memref<8x128xbf16, #tpu.memory_space<vmem>>, %arg13: memref<8x128xf32, #tpu.memory_space<vmem>>) attributes {dimension_semantics = [#tpu.dimension_semantics<parallel>, #tpu.dimension_semantics<arbitrary>], iteration_bounds = array<i64: 1, 2>, scalar_prefetch = 0 : i64, scratch_operands = 2 : i64, tpu.core_type = #tpu.core_type<tc>, window_params = [{transform_indices = @transform_0, window_bounds = array<i64: 8, 128>}, {transform_indices = @transform_1, window_bounds = array<i64: 8, 128>}, {pipeline_mode = #tpu.pipeline_mode<synchronous>, transform_indices = @transform_2, window_bounds = array<i64: 128, 128>}, {pipeline_mode = #tpu.pipeline_mode<synchronous>, transform_indices = @transform_3, window_bounds = array<i64: 128, 128>}, {pipeline_mode = #tpu.pipeline_mode<synchronous>, transform_indices = @transform_4, window_bounds = array<i64: 1, 128>}, {transform_indices = @transform_5, window_bounds = array<i64: 1, 128, 128>}, {transform_indices = @transform_6, window_bounds = array<i64: 1, 1, 128>}, {pipeline_mode = #tpu.pipeline_mode<synchronous>, transform_indices = @transform_7, window_bounds = array<i64: 128, 128>}, {pipeline_mode = #tpu.pipeline_mode<synchronous>, transform_indices = @transform_8, window_bounds = array<i64: 1, 128>}, {transform_indices = @transform_9, window_bounds = array<i64: 8, 128>}]} {
    %c0_i32 = arith.constant 0 : i32
    %0 = arith.cmpi eq, %arg1, %c0_i32 : i32
    %1 = arith.extui %0 : i1 to i32
    %c0_i32_0 = arith.constant 0 : i32
    %2 = arith.cmpi ne, %1, %c0_i32_0 : i32
    scf.if %2 {
      %c0_14 = arith.constant 0 : index
      %c0_15 = arith.constant 0 : index
      %21 = vector.load %arg2[%c0_14, %c0_15] : memref<8x128xbf16, #tpu.memory_space<vmem>>, vector<8x128xbf16>
      %c0_16 = arith.constant 0 : index
      %c0_17 = arith.constant 0 : index
      %22 = vector.load %arg3[%c0_16, %c0_17] : memref<8x128xbf16, #tpu.memory_space<vmem>>, vector<8x128xbf16>
      %c0_18 = arith.constant 0 : index
      %c0_19 = arith.constant 0 : index
      %23 = vector.load %arg4[%c0_18, %c0_19] : memref<128x128xbf16, #tpu.memory_space<vmem>>, vector<128x128xbf16>
      %cst_20 = arith.constant dense<0.000000e+00> : vector<8x128xf32>
      %24 = tpu.matmul %21, %23, %cst_20 {dimension_numbers = #tpu.dot_dimension_numbers<[1], [0], [0], [1], [0, 0, 1, 1], [], []>} : vector<8x128xbf16>, vector<128x128xbf16>, vector<8x128xf32> -> vector<8x128xf32>
      %c0_21 = arith.constant 0 : index
      %c0_22 = arith.constant 0 : index
      %25 = vector.load %arg5[%c0_21, %c0_22] : memref<128x128xbf16, #tpu.memory_space<vmem>>, vector<128x128xbf16>
      %cst_23 = arith.constant dense<0.000000e+00> : vector<8x128xf32>
      %26 = tpu.matmul %22, %25, %cst_23 {dimension_numbers = #tpu.dot_dimension_numbers<[1], [0], [0], [1], [0, 0, 1, 1], [], []>} : vector<8x128xbf16>, vector<128x128xbf16>, vector<8x128xf32> -> vector<8x128xf32>
      %27 = arith.addf %24, %26 : vector<8x128xf32>
      %c0_24 = arith.constant 0 : index
      %c0_25 = arith.constant 0 : index
      %28 = vector.load %arg6[%c0_24, %c0_25] : memref<1x128xf32, #tpu.memory_space<vmem>>, vector<1x128xf32>
      %29 = vector.broadcast %28 : vector<1x128xf32> to vector<8x128xf32>
      %30 = arith.addf %27, %29 : vector<8x128xf32>
      %cst_26 = arith.constant 2.000000e-01 : f32
      %31 = vector.broadcast %cst_26 : f32 to vector<8x128xf32>
      %32 = arith.mulf %31, %30 : vector<8x128xf32>
      %33 = arith.maximumf %30, %32 : vector<8x128xf32>
      %34 = arith.truncf %33 : vector<8x128xf32> to vector<8x128xbf16>
      %c0_27 = arith.constant 0 : index
      %c0_28 = arith.constant 0 : index
      %35 = vector.load %arg12[%c0_27, %c0_28] : memref<8x128xbf16, #tpu.memory_space<vmem>>, vector<8x128xbf16>
      tpu.vector_store %arg12[%c0_27, %c0_28], %34 {strides = array<i32>} : memref<8x128xbf16, #tpu.memory_space<vmem>>, vector<8x128xbf16>,
      %36 = arith.extf %21 : vector<8x128xbf16> to vector<8x128xf32>
      %37 = arith.extf %22 : vector<8x128xbf16> to vector<8x128xf32>
      %38 = arith.addf %36, %37 : vector<8x128xf32>
      %c0_29 = arith.constant 0 : index
      %c0_30 = arith.constant 0 : index
      %39 = vector.load %arg13[%c0_29, %c0_30] : memref<8x128xf32, #tpu.memory_space<vmem>>, vector<8x128xf32>
      tpu.vector_store %arg13[%c0_29, %c0_30], %38 {strides = array<i32>} : memref<8x128xf32, #tpu.memory_space<vmem>>, vector<8x128xf32>,
    } else {
    }
    %c0 = arith.constant 0 : index
    %c0_1 = arith.constant 0 : index
    %3 = vector.load %arg12[%c0, %c0_1] : memref<8x128xbf16, #tpu.memory_space<vmem>>, vector<8x128xbf16>
    %c0_2 = arith.constant 0 : index
    %c0_3 = arith.constant 0 : index
    %c0_4 = arith.constant 0 : index
    %4 = vector.load %arg7[%c0_2, %c0_3, %c0_4] : memref<1x128x128xbf16, #tpu.memory_space<vmem>>, vector<1x128x128xbf16>
    %5 = vector.shape_cast %4 : vector<1x128x128xbf16> to vector<128x128xbf16>
    %cst = arith.constant dense<0.000000e+00> : vector<8x128xf32>
    %6 = tpu.matmul %3, %5, %cst {dimension_numbers = #tpu.dot_dimension_numbers<[1], [0], [0], [1], [0, 0, 1, 1], [], []>} : vector<8x128xbf16>, vector<128x128xbf16>, vector<8x128xf32> -> vector<8x128xf32>
    %c0_5 = arith.constant 0 : index
    %c0_6 = arith.constant 0 : index
    %c0_7 = arith.constant 0 : index
    %7 = vector.load %arg8[%c0_5, %c0_6, %c0_7] : memref<1x1x128xf32, #tpu.memory_space<vmem>>, vector<1x1x128xf32>
    %8 = vector.shape_cast %7 : vector<1x1x128xf32> to vector<1x128xf32>
    %9 = vector.broadcast %8 : vector<1x128xf32> to vector<8x128xf32>
    %10 = arith.addf %6, %9 : vector<8x128xf32>
    %c0_8 = arith.constant 0 : index
    %c0_9 = arith.constant 0 : index
    %11 = vector.load %arg13[%c0_8, %c0_9] : memref<8x128xf32, #tpu.memory_space<vmem>>, vector<8x128xf32>
    %12 = arith.addf %10, %11 : vector<8x128xf32>
    %cst_10 = arith.constant 2.000000e-01 : f32
    %13 = vector.broadcast %cst_10 : f32 to vector<8x128xf32>
    %14 = arith.mulf %13, %12 : vector<8x128xf32>
    %15 = arith.maximumf %12, %14 : vector<8x128xf32>
    %16 = arith.truncf %15 : vector<8x128xf32> to vector<8x128xbf16>
    %c0_11 = arith.constant 0 : index
    %c0_12 = arith.constant 0 : index
    %17 = vector.load %arg12[%c0_11, %c0_12] : memref<8x128xbf16, #tpu.memory_space<vmem>>, vector<8x128xbf16>
    tpu.vector_store %arg12[%c0_11, %c0_12], %16 {strides = array<i32>} : memref<8x128xbf16, #tpu.memory_space<vmem>>, vector<8x128xbf16>,
    %c1_i32 = arith.constant 1 : i32
    %18 = arith.cmpi eq, %arg1, %c1_i32 : i32
    %19 = arith.extui %18 : i1 to i32
    %c0_i32_13 = arith.constant 0 : i32
    %20 = arith.cmpi ne, %19, %c0_i32_13 : i32
    scf.if %20 {
      %c0_14 = arith.constant 0 : index
      %c0_15 = arith.constant 0 : index
      %21 = vector.load %arg12[%c0_14, %c0_15] : memref<8x128xbf16, #tpu.memory_space<vmem>>, vector<8x128xbf16>
      %c0_16 = arith.constant 0 : index
      %c0_17 = arith.constant 0 : index
      %22 = vector.load %arg9[%c0_16, %c0_17] : memref<128x128xbf16, #tpu.memory_space<vmem>>, vector<128x128xbf16>
      %cst_18 = arith.constant dense<0.000000e+00> : vector<8x128xf32>
      %23 = tpu.matmul %21, %22, %cst_18 {dimension_numbers = #tpu.dot_dimension_numbers<[1], [0], [0], [1], [0, 0, 1, 1], [], []>} : vector<8x128xbf16>, vector<128x128xbf16>, vector<8x128xf32> -> vector<8x128xf32>
      %c0_19 = arith.constant 0 : index
      %c0_20 = arith.constant 0 : index
      %24 = vector.load %arg10[%c0_19, %c0_20] : memref<1x128xf32, #tpu.memory_space<vmem>>, vector<1x128xf32>
      %25 = vector.broadcast %24 : vector<1x128xf32> to vector<8x128xf32>
      %26 = arith.addf %23, %25 : vector<8x128xf32>
      %cst_21 = arith.constant 0.000000e+00 : f32
      %27 = vector.broadcast %cst_21 : f32 to vector<8x128xf32>
      %28 = arith.maximumf %26, %27 : vector<8x128xf32>
      %c0_22 = arith.constant 0 : index
      %c0_23 = arith.constant 0 : index
      %29 = vector.load %arg11[%c0_22, %c0_23] : memref<8x128xf32, #tpu.memory_space<vmem>>, vector<8x128xf32>
      tpu.vector_store %arg11[%c0_22, %c0_23], %28 {strides = array<i32>} : memref<8x128xf32, #tpu.memory_space<vmem>>, vector<8x128xf32>,
    } else {
    }
    return
  }
  func.func @transform_0(%arg0: i32, %arg1: i32) -> (i32, i32) {
    %c0_i32 = arith.constant 0 : i32
    %c0_i32_0 = arith.constant 0 : i32
    return %arg0, %c0_i32 : i32, i32
  }
  func.func @transform_1(%arg0: i32, %arg1: i32) -> (i32, i32) {
    %c0_i32 = arith.constant 0 : i32
    %c0_i32_0 = arith.constant 0 : i32
    return %arg0, %c0_i32 : i32, i32
  }
  func.func @transform_2(%arg0: i32, %arg1: i32) -> (i32, i32) {
    %c0_i32 = arith.constant 0 : i32
    %c0_i32_0 = arith.constant 0 : i32
    %c0_i32_1 = arith.constant 0 : i32
    return %c0_i32, %c0_i32_0 : i32, i32
  }
  func.func @transform_3(%arg0: i32, %arg1: i32) -> (i32, i32) {
    %c0_i32 = arith.constant 0 : i32
    %c0_i32_0 = arith.constant 0 : i32
    %c0_i32_1 = arith.constant 0 : i32
    return %c0_i32, %c0_i32_0 : i32, i32
  }
  func.func @transform_4(%arg0: i32, %arg1: i32) -> (i32, i32) {
    %c0_i32 = arith.constant 0 : i32
    %c0_i32_0 = arith.constant 0 : i32
    %c0_i32_1 = arith.constant 0 : i32
    return %c0_i32, %c0_i32_0 : i32, i32
  }
  func.func @transform_5(%arg0: i32, %arg1: i32) -> (i32, i32, i32) {
    %c0_i32 = arith.constant 0 : i32
    %c0_i32_0 = arith.constant 0 : i32
    %c0_i32_1 = arith.constant 0 : i32
    return %arg1, %c0_i32, %c0_i32_0 : i32, i32, i32
  }
  func.func @transform_6(%arg0: i32, %arg1: i32) -> (i32, i32, i32) {
    %c0_i32 = arith.constant 0 : i32
    %c0_i32_0 = arith.constant 0 : i32
    %c0_i32_1 = arith.constant 0 : i32
    return %arg1, %c0_i32, %c0_i32_0 : i32, i32, i32
  }
  func.func @transform_7(%arg0: i32, %arg1: i32) -> (i32, i32) {
    %c0_i32 = arith.constant 0 : i32
    %c0_i32_0 = arith.constant 0 : i32
    %c0_i32_1 = arith.constant 0 : i32
    return %c0_i32, %c0_i32_0 : i32, i32
  }
  func.func @transform_8(%arg0: i32, %arg1: i32) -> (i32, i32) {
    %c0_i32 = arith.constant 0 : i32
    %c0_i32_0 = arith.constant 0 : i32
    %c0_i32_1 = arith.constant 0 : i32
    return %c0_i32, %c0_i32_0 : i32, i32
  }
  func.func @transform_9(%arg0: i32, %arg1: i32) -> (i32, i32) {
    %c0_i32 = arith.constant 0 : i32
    %c0_i32_0 = arith.constant 0 : i32
    return %arg0, %c0_i32 : i32, i32
  }
}

</mosaic_0001>

<bundles_post_ra>
// kernel: tpu_custom_call.1
= control target key start
LH: loop header
LB: loop body
LE: loop exit
PB: predicated region body
PF: predicated region fallthrough
CT: control target
= control target key end

     0   :  { %s1778_s0 = inlined_call_operand.hbm [shape: bf16[8,128], index: 0, kind: input, shape index: {}]   ;;  %s1779_s1 = inlined_call_operand.hbm [shape: bf16[8,128], index: 1, kind: input, shape index: {}]   ;;  %s1780_s2 = inlined_call_operand.hbm [shape: bf16[128,128], index: 2, kind: input, shape index: {}]   ;;  %s1781_s3 = inlined_call_operand.hbm [shape: bf16[128,128], index: 3, kind: input, shape index: {}]   ;;  %s1782_s4 = inlined_call_operand.vmem [shape: f32[1,128], index: 4, kind: input, shape index: {}]   ;;  %s1783_s5 = inlined_call_operand.hbm [shape: bf16[2,128,128], index: 5, kind: input, shape index: {}]   ;;  %s1784_s6 = inlined_call_operand.vmem [shape: f32[2,1,128], index: 6, kind: input, shape index: {}]   ;;  %s1785_s7 = inlined_call_operand.hbm [shape: bf16[128,128], index: 7, kind: input, shape index: {}]   ;;  %s1786_s8 = inlined_call_operand.vmem [shape: f32[1,128], index: 8, kind: input, shape index: {}]   ;;  %s1787_s9 = inlined_call_operand.hbm [shape: f32[8,128], index: 9, kind: output, shape index: {}]  }
   0x1   :  { %1790 = sst [smem:[#allocation21_spill]] %s1778_s0 }
   0x2   :  { %1791 = sst [smem:[#allocation22_spill]] %s1779_s1 }
   0x3   :  { %1792 = sst [smem:[#allocation23_spill]] %s1780_s2 }
   0x4   :  { %1793 = sst [smem:[#allocation24_spill]] %s1781_s3 }
   0x5   :  { %14 = vsyncpa [#allocation5], 0 }
   0x6   :  { %15 = vsyncpa [#allocation8], 0 }
   0x7   :  { %16 = vsyncpa [#allocation11], 0 }
   0x8   :  { %17 = vsyncpa [#allocation6], 0  ;;  %s1584_s30 = smov 0   ;;  %s1586_s10 = smov 0  }
   0x9   :  { %s1588_s11 = smov 0   ;;  %s1590_s12 = smov 0  }
   0xa   :  { %s1592_s13 = smov 0   ;;  %s1594_s14 = smov 0  }
   0xb LB: > { %s1613_s15 = sadd.s32 4294967295, %s1524_s14   ;;  %p170_p0 = scmp.ne.s32.totalorder %s1508_s10, %s1504_s30  ;;  %s1524_s14 = sphi %s1594_s14, %s23_s14   ;;  %s1520_s13 = sphi %s1592_s13, %s1809_s13   ;;  %s1516_s12 = sphi %s1590_s12, %s1808_s12   ;;  %s1512_s11 = sphi %s1588_s11, %s1807_s11   ;;  %s1508_s10 = sphi %s1586_s10, %s1806_s10   ;;  %s1504_s30 = sphi %s1584_s30, %s1805_s30  }
   0xc   : > { %p171_p1 = scmp.eq.s32.totalorder %s1613_s15, 0  ;;  %p944_p2 = scmp.ge.s32.totalorder %s1524_s14, 1 }
   0xd   : > { %p275_p3 = scmp.lt.s32.totalorder %s1524_s14, 3  ;;  %s1795_s1 = sld [smem:[#allocation22_spill]] }
   0xe   : > { %p1621_p4 = por %p171_p1, %p170_p0  ;;  %s1526_s21 = smov [#allocation7]  }
   0xf   : > { %p1628_p5 = pnand %p944_p2, %p275_p3  ;;  %s305_s22 = sshll.u32 %s1526_s21, 4  ;;  %s306_s22 = int_to_ptr.vmem [resolvable:$true] %s305_s22 }
  0x10   : > { %s1798_s0 = sld [smem:[#allocation21_spill]]  ;;  %s1527_s27 = smov [#allocation4]  }
  0x11   : > { %p1154_p6 = pneg %p1628_p5  ;;  %s291_s28 = sshll.u32 %s1527_s27, 4  ;;  %s292_s28 = int_to_ptr.vmem [resolvable:$true] %s291_s28 }
  0x12   : > { %s1799_s2 = sld [smem:[#allocation23_spill]]  ;;  %s1528_s18 = smov [#allocation9]  }
  0x13   : > { %s303_s19 = sshll.u32 %s1795_s1, 4  ;;  %p1636_p7 = pnand %p1154_p6, %p171_p1  ;;  %s304_s19 = int_to_ptr.hbm [resolvable:$true] %s303_s19 }
  0x14   : > { %s316_s21 = sshll.u32 %s1528_s18, 4  ;;  %s1800_s3 = sld [smem:[#allocation24_spill]]  ;;  %s317_s21 = int_to_ptr.vmem [resolvable:$true] %s316_s21 }
  0x15   : > { %1160 = dma.hbm_to_vmem [thread:$0]  (!%p1636_p7), %s304_s19, 64, %s306_s22, [#allocation8]  }
  0x16   : > { %s289_s26 = sshll.u32 %s1798_s0, 4  ;;  %s1788_s22 = smov 64   ;;  %s290_s26 = int_to_ptr.hbm [resolvable:$true] %s289_s26 }
  0x17   : > { %1157 = dma.hbm_to_vmem [thread:$0]  (!%p1636_p7), %s290_s26, 64, %s292_s28, [#allocation5]  }
  0x18   : > { %s314_s17 = sshll.u32 %s1799_s2, 4  ;;  %s1789_s27 = smov 4   ;;  %s315_s17 = int_to_ptr.hbm [resolvable:$true] %s314_s17 }
  0x19   : > { %1163 = dma.hbm_to_vmem [thread:$0]  (!%p1636_p7), %s315_s17, 1024, %s317_s21, [#allocation8], %s1788_s22, %s1788_s22, %s1789_s27  }
  0x1a   : > { %s328_s19 = sshll.u32 %s1800_s3, 4  ;;  %s1531_s26 = smov [#allocation10]   ;;  %s329_s19 = int_to_ptr.hbm [resolvable:$true] %s328_s19 }
  0x1b   : > { %s330_s28 = sshll.u32 %s1531_s26, 4  ;;  %s345_s18 = sshll.u32 %s1785_s7, 4  ;;  %s331_s28 = int_to_ptr.vmem [resolvable:$true] %s330_s28  ;;  %s346_s18 = int_to_ptr.hbm [resolvable:$true] %s345_s18 }
  0x1c   : > { %1166 = dma.hbm_to_vmem [thread:$0]  (!%p1636_p7), %s329_s19, 1024, %s331_s28, [#allocation11], %s1788_s22, %s1788_s22, %s1789_s27  }
  0x1d   : > { %s1532_s17 = smov [#allocation13]   ;;  %s32_s24 = sadd.s32 1, %s1520_s13 }
  0x1e   : > { %s347_s21 = sshll.u32 %s1532_s17, 4  ;;  %p33_p8 = scmp.ge.s32.totalorder %s32_s24, 2  ;;  %s348_s21 = int_to_ptr.vmem [resolvable:$true] %s347_s21 }
  0x1f   : > { %1169 = dma.hbm_to_vmem [thread:$0]  (!%p1636_p7), %s346_s18, 1024, %s348_s21, [#allocation8], %s1788_s22, %s1788_s22, %s1789_s27  }
  0x20   : > { %s157_s25 = sadd.s32 1, %s1512_s11  ;;  %p164_p9 = scmp.ne.s32.totalorder %s1512_s11, %s1508_s10 }
  0x21   : > { %p165_p10 = scmp.eq.s32.totalorder %s1524_s14, 0  ;;  %s1811_s24 = smov (%p33_p8, %s32_s24), 0 }
  0x22   : > { %p1179_p12 = scmp.lt.s32.totalorder %s1524_s14, 2  ;;  %s154_s23 = ssub.s32 %s1520_s13, %s1811_s24 }
  0x23   : > { %p1678_p11 = por %p165_p10, %p164_p9  ;;  %s364_s26 = sand.u32 1, %s1524_s14  }
  0x24   : > { %p155_p13 = scmp.eq.s32.totalorder %s154_s23, 0  ;;  %s366_s28 = sand.u32 1, %s1512_s11  }
  0x25   : > { %s1095_s29 = sshll.u32 %s1520_s13, 6  ;;  %s951_s18 = sshll.u32 %s366_s28, 6 }
  0x26   : > { %s1689_s30 = scalar_select %p155_p13, %s1512_s11, %s157_s25  }
  0x27   : > { %s373_s22 = scalar_lea.hbm %s1783_s5, %s1095_s29  ;;  %s368_s0 = scalar_lea.vmem [#allocation12], %s951_s18 }
  0x28   : > { %s374_s27 = sshll.u32 %s373_s22, 4  ;;  %s376_s1 = sshll.u32 %s368_s0, 4  ;;  %s375_s27 = int_to_ptr.hbm [resolvable:$true] %s374_s27  ;;  %s377_s1 = int_to_ptr.vmem [resolvable:$true] %s376_s1 }
  0x29   : > { %p1171_p0 = pnand %p1179_p12, %p1678_p11  ;;  %s365_s2 = scalar_lea.sflag [#allocation5], %s364_s26 }
  0x2a   : > { %s1802_s3 = smov 4   ;;  %s1803_s23 = smov 64  }
  0x2b   : > { %1173 = dma.hbm_to_vmem [thread:$0]  (!%p1171_p0), %s375_s27, 1024, %s377_s1, %s365_s2, %s1803_s23, %s1803_s23, %s1802_s3  }
  0x2c   : > { %394 = sbr.rel (%p1628_p5) target bundleno = 579 (0x243), region = 56 }
  0x31   : > { %1479 = dma.done.wait (%p171_p1), [#allocation5], 64  }
  0x32   : > { %1481 = vsyncadd (%p171_p1), [#allocation5], 4294967232 }
  0x33   : > { %1483 = dma.done.wait (%p171_p1), [#allocation8], 1088  }
  0x34   : > { %1485 = vsyncadd (%p171_p1), [#allocation8], 4294966208 }
  0x35   : > { %1487 = dma.done.wait (%p171_p1), [#allocation11], 1024  }
  0x36   : > { %1489 = vsyncadd (%p171_p1), [#allocation11], 4294966272  ;;  %s416_s0 = sand.u32 1, %s1613_s15   ;;  %s418_s1 = sand.u32 1, %s1508_s10  }
  0x37   : > { %s959_s2 = sshll.u32 %s418_s1, 6  ;;  %s417_s3 = scalar_lea.sflag [#allocation5], %s416_s0 }
  0x38   : > { %s1717_s20 = scalar_lea.vmem [#allocation12], %s959_s2 }
  0x39   : > { %1491 = dma.done.wait (%p1621_p4), %s417_s3, 1024  }
  0x3a   : > { %1493 = vsyncadd (%p1621_p4), %s417_s3, 4294966272 }
  0x3b   : > { %1495 = dma.done.wait (%p171_p1), [#allocation8], 1024  }
  0x3c   : > { %1497 = vsyncadd (%p171_p1), [#allocation8], 4294966272  ;;  %p459_p2 = scmp.lt.s32.totalorder %s1516_s12, 1  ;;  %p961_p3 = scmp.ne.s32.totalorder %s1516_s12, 0 }
  0x3e   : > { %s1729_s22 = scalar_select %p459_p2, %s1516_s12, 1 }
  0x3f   : > { %465 = sbr.rel (%p961_p3) target bundleno = 238 (0xee), region = 84 }
  0x40   : > { %s461_s19 = scalar_lea.vmem %s1784_s6, %s1729_s22 }
  0x44   : > { %v1111_v0 = vld [vmem:[#allocation10 + $0x38] sm:$0xff]  ;;  %v1110_v2 = vld [vmem:[#allocation10 + $0x30] sm:$0xff]  ;;  %v1109_v6 = vld [vmem:[#allocation10 + $0x28] sm:$0xff] }
  0x45   : > { %v1103_v1 = vld [vmem:[#allocation9 + $0x38] sm:$0xff]  ;;  %548 = vmatpush.bf16.msra.mxu0 %v1111_v0  ;;  %v1102_v3 = vld [vmem:[#allocation9 + $0x30] sm:$0xff]  ;;  %v1101_v7 = vld [vmem:[#allocation9 + $0x28] sm:$0xff] }
  0x46   : > { %609 = vmatpush.bf16.msra.mxu1 %v1103_v1  ;;  %v467_v4 = vld [vmem:[#allocation7] sm:$0xf]  ;;  %v466_v5 = vld [vmem:[#allocation4] sm:$0xf]  ;;  %v1108_v11 = vld [vmem:[#allocation10 + $0x20] sm:$0xff] }
  0x47   : > { %v632_v8 = vunpack.c.l.bf16 %v467_v4  ;;  %v631_v9 = vunpack.c.l.bf16 %v466_v5  ;;  %v1100_v12 = vld [vmem:[#allocation9 + $0x20] sm:$0xff]  ;;  %v1107_v13 = vld [vmem:[#allocation10 + $0x18] sm:$0xff]  ;;  %v1106_v15 = vld [vmem:[#allocation10 + $0x10] sm:$0xff] }
  0x48   : > { %v1099_v14 = vld [vmem:[#allocation9 + $0x18] sm:$0xff]  ;;  %v1098_v16 = vld [vmem:[#allocation9 + $0x10] sm:$0xff]  ;;  %v1105_v17 = vld [vmem:[#allocation10 + $0x8] sm:$0xff] }
  0x49   : > { %549 = vmatpush.bf16.msra.mxu0 %v1110_v2  ;;  %v633_v10 = vadd.f32 %v632_v8, %v631_v9  ;;  %v1097_v18 = vld [vmem:[#allocation9 + $0x8] sm:$0xff]  ;;  %v1104_v19 = vld [vmem:[#allocation10] sm:$0xff] }
  0x4a   : > { %610 = vmatpush.bf16.msra.mxu1 %v1102_v3  ;;  %v1096_v20 = vld [vmem:[#allocation9] sm:$0xff]  ;;  %v1243_v21 = vld [vmem:[%s1782_s4] ss:$0 sm:$0xff] }
  0x4b   : > { %634 = vst [vmem:[#allocation3] sm:$0xff] %v633_v10 }
  0x4d   : > { %550 = vmatpush.bf16.msra.mxu0 %v1109_v6 }
  0x4e   : > { %611 = vmatpush.bf16.msra.mxu1 %v1101_v7 }
  0x51   : > { %551 = vmatpush.bf16.msra.mxu0 %v1108_v11 }
  0x52   : > { %612 = vmatpush.bf16.msra.mxu1 %v1100_v12 }
  0x55   : > { %552 = vmatpush.bf16.msra.mxu0 %v1107_v13 }
  0x56   : > { %613 = vmatpush.bf16.msra.mxu1 %v1099_v14 }
  0x59   : > { %553 = vmatpush.bf16.msra.mxu0 %v1106_v15 }
  0x5a   : > { %614 = vmatpush.bf16.msra.mxu1 %v1098_v16 }
  0x5d   : > { %554 = vmatpush.bf16.msra.mxu0 %v1105_v17 }
  0x5e   : > { %615 = vmatpush.bf16.msra.mxu1 %v1097_v18 }
  0x61   : > { %555 = vmatpush.bf16.msra.mxu0 %v1104_v19 }
  0x62   : > { %616 = vmatpush.bf16.msra.mxu1 %v1096_v20 }
  0x64   : > { %556 = vmatmul.bf16.vlgmr.msra.gmra.mxu0 %v467_v4 }
  0x65   : > { %617 = vmatmul.bf16.vlgmr.msra.gmra.mxu1 %v466_v5 }
  0xe1   : > { %v557_v22 = vpop.f32.mrf.mxu0 }
  0xe2   : > { %v618_v23 = vpop.f32.mrf.mxu1 }
  0xe3   : > { %v619_v24 = vadd.f32 %v618_v23, %v557_v22 }
  0xe5   : > { %v626_v25 = vadd.f32 %v1243_v21, %v619_v24 }
  0xe7   : > { %v627_v26 = vmul.f32 0.2, %v626_v25 }
  0xe9   : > { %v628_v27 = vmax.f32 %v626_v25, %v627_v26  ;;  %v559_v28 = vpop.f32.mrf.mxu0 }
  0xea   : > { %v620_v29 = vpop.f32.mrf.mxu1 }
  0xeb   : > { %v629_v30 = vpack.c.bf16 %v628_v27, %v628_v27 }
  0xed   : > { %630 = vst [vmem:[#allocation2] sm:$0xf] %v629_v30 }
  0xee PF: > { %v1119_v31 = vld [vmem:[%s1717_s20 + $0x38] sm:$0xff]  ;;  %v1118_v32 = vld [vmem:[%s1717_s20 + $0x30] sm:$0xff]  ;;  %v1117_v33 = vld [vmem:[%s1717_s20 + $0x28] sm:$0xff]  ;;  %p1058_p1 = scmp.ne.s32.totalorder %s1516_s12, 1 }
  0xef   : > { %704 = vmatpush.bf16.msra.mxu0 %v1119_v31  ;;  %v1116_v34 = vld [vmem:[%s1717_s20 + $0x20] sm:$0xff]  ;;  %v1115_v35 = vld [vmem:[%s1717_s20 + $0x18] sm:$0xff]  ;;  %v1114_v36 = vld [vmem:[%s1717_s20 + $0x10] sm:$0xff] }
  0xf0   : > { %v1113_v37 = vld [vmem:[%s1717_s20 + $0x8] sm:$0xff]  ;;  %v1112_v38 = vld [vmem:[%s1717_s20] sm:$0xff]  ;;  %v717_v42 = vld [vmem:[#allocation3] sm:$0xff] }
  0xf1   : > { %v1244_v40 = vld [vmem:[%s461_s19] ss:$0 sm:$0xff] }
  0xf3   : > { %705 = vmatpush.bf16.msra.mxu0 %v1118_v32 }
  0xf4   : > { %v635_v39 = vld [vmem:[#allocation2] sm:$0xf] }
  0xf7   : > { %706 = vmatpush.bf16.msra.mxu0 %v1117_v33 }
  0xfb   : > { %707 = vmatpush.bf16.msra.mxu0 %v1116_v34 }
  0xff   : > { %708 = vmatpush.bf16.msra.mxu0 %v1115_v35 }
 0x103   : > { %709 = vmatpush.bf16.msra.mxu0 %v1114_v36 }
 0x107   : > { %710 = vmatpush.bf16.msra.mxu0 %v1113_v37 }
 0x10b   : > { %711 = vmatpush.bf16.msra.mxu0 %v1112_v38 }
 0x10e   : > { %712 = vmatmul.bf16.vlgmr.msra.gmra.mxu0 %v635_v39 }
 0x18b   : > { %v713_v41 = vpop.f32.mrf.mxu0 }
 0x18c   : > { %v714_v43 = vadd.f32 %v1244_v40, %v713_v41 }
 0x18e   : > { %v718_v44 = vadd.f32 %v717_v42, %v714_v43 }
 0x190   : > { %v719_v45 = vmul.f32 0.2, %v718_v44 }
 0x192   : > { %v720_v46 = vmax.f32 %v718_v44, %v719_v45  ;;  %726 = sbr.rel (%p1058_p1) target bundleno = 573 (0x23d), region = 88 }
 0x193   : > { %v715_v47 = vpop.f32.mrf.mxu0 }
 0x194   : > { %v721_v48 = vpack.c.bf16 %v720_v46, %v720_v46 }
 0x196   : > { %722 = vst [vmem:[#allocation2] sm:$0xf] %v721_v48 }
 0x197   : > { %v1127_v49 = vld [vmem:[#allocation13 + $0x38] sm:$0xff]  ;;  %v1126_v50 = vld [vmem:[#allocation13 + $0x30] sm:$0xff]  ;;  %v1125_v51 = vld [vmem:[#allocation13 + $0x28] sm:$0xff] }
 0x198   : > { %796 = vmatpush.bf16.msra.mxu0 %v1127_v49  ;;  %v1124_v52 = vld [vmem:[#allocation13 + $0x20] sm:$0xff]  ;;  %v1123_v53 = vld [vmem:[#allocation13 + $0x18] sm:$0xff]  ;;  %v1122_v54 = vld [vmem:[#allocation13 + $0x10] sm:$0xff] }
 0x199   : > { %v1121_v55 = vld [vmem:[#allocation13 + $0x8] sm:$0xff]  ;;  %v1120_v56 = vld [vmem:[#allocation13] sm:$0xff] }
 0x19a   : > { %v1245_v58 = vld [vmem:[%s1786_s8] ss:$0 sm:$0xff] }
 0x19c   : > { %797 = vmatpush.bf16.msra.mxu0 %v1126_v50 }
 0x19d   : > { %v727_v57 = vld [vmem:[#allocation2] sm:$0xf] }
 0x1a0   : > { %798 = vmatpush.bf16.msra.mxu0 %v1125_v51 }
 0x1a4   : > { %799 = vmatpush.bf16.msra.mxu0 %v1124_v52 }
 0x1a8   : > { %800 = vmatpush.bf16.msra.mxu0 %v1123_v53 }
 0x1ac   : > { %801 = vmatpush.bf16.msra.mxu0 %v1122_v54 }
 0x1b0   : > { %802 = vmatpush.bf16.msra.mxu0 %v1121_v55 }
 0x1b4   : > { %803 = vmatpush.bf16.msra.mxu0 %v1120_v56 }
 0x1b7   : > { %804 = vmatmul.bf16.vlgmr.msra.gmra.mxu0 %v727_v57 }
 0x234   : > { %v805_v59 = vpop.f32.mrf.mxu0 }
 0x235   : > { %v806_v60 = vadd.f32 %v1245_v58, %v805_v59 }
 0x237   : > { %v809_v61 = vmax.f32 %v806_v60, 0.0 }
 0x239   : > { %810 = vst [vmem:[#allocation14] sm:$0xff] %v809_v61 }
 0x23c   : > { %v807_v62 = vpop.f32.mrf.mxu0 }
 0x23d PF: > { %p1185_p4 = scmp.eq.s32.totalorder %s1613_s15, 1  ;;  %s821_s23 = sshll.u32 %s1787_s9, 4  ;;  %s822_s23 = int_to_ptr.hbm [resolvable:$true] %s821_s23 }
 0x23e   : > { %s1533_s0 = smov [#allocation14]  }
 0x23f   : > { %s819_s1 = sshll.u32 %s1533_s0, 4  ;;  %s820_s1 = int_to_ptr.vmem [resolvable:$true] %s819_s1 }
 0x240   : > { %1151 = dma.vmem_to_hbm [thread:$0]  (%p1185_p4), %s820_s1, 128, %s822_s23, [#allocation6]  }
 0x241   : > { %1499 = dma.done.wait (%p1185_p4), [#allocation6], 128  }
 0x242   : > { %1501 = vsyncadd (%p1185_p4), [#allocation6], 4294967168 }
 0x243 PF: > { %s23_s14 = sadd.s32 1, %s1524_s14   ;;  %s1804_s2 = smov %s1689_s30 }
 0x244   : > { %p20_p5 = scmp.ge.s32.totalorder %s23_s14, 4   ;;  %s1805_s30 = smov %s1508_s10 }
 0x245   : > { %s1806_s10 = smov %s1512_s11  ;;  %s1807_s11 = smov %s1804_s2 }
 0x246   : > { %s1808_s12 = smov %s1520_s13  ;;  %s1809_s13 = smov %s1811_s24 }
 0x247   :  { %22 = sbr.rel (!%p20_p5) target bundleno = 11 (0xb), region = 126 }
 0x24c   :  { %835 = vsyncpa [#allocation5], 1 }
 0x24d   :  { %837 = vsyncpa [#allocation5 + $0x1], 1 }
 0x24e   :  { %838 = vsyncpa [#allocation8], 1 }
 0x24f   :  { %839 = vsyncpa [#allocation11], 1 }
 0x250   :  { %840 = vsyncpa [#allocation6], 1 }
 0x251   :  { %842 = vsyncpa [#allocation6 + $0x1], 1 }

</bundles_post_ra>
